<compile_context>
chip_gen: v6e
topology: v6e:2x2x1
jax: 0.10.0
libtpu: 0.0.40
codegen_flags: <defaults>
</compile_context>

<pallas_src>
import functools

import jax
import jax.numpy as jnp
from jax import lax
from jax.experimental import pallas as pl
from jax.experimental.pallas import tpu as pltpu


# Tap index (ky*3 + kx) -> column of the packed mask array, or None (center).
# Mask columns: 0=top(h>0) 1=bot(h<H-1) 2=left(w>0) 3=right(w<W-1)
#               4=top&left 5=top&right 6=bot&left 7=bot&right
_TAP_MASK_COL = (4, 0, 5,
                 2, None, 3,
                 6, 1, 7)


def _bottleneck_kernel(x_ref, w1_ref, b1_ref, w2_ref, b2_ref, w3_ref, b3_ref,
                       m_ref, o_ref, *, W, planes):
    rows = x_ref.shape[1]          # batch_tile * H * W (sublane axis)
    cdt = w1_ref.dtype             # MXU compute dtype (bf16 or f32)

    # ---- conv1 (1x1) -> bn1 (scale folded into w1) + bias -> relu ----------
    h1 = jnp.dot(x_ref[0].astype(cdt), w1_ref[...],
                 preferred_element_type=jnp.float32)
    h1 = jnp.maximum(h1 + b1_ref[...], 0.0)                # (rows, planes) f32

    # ---- conv2 (3x3, stride=1, pad=1), weight-side form ---------------------
    # One matmul produces all 9 taps at once: z[:, t*planes:(t+1)*planes] is
    # h1 @ w2[ky, kx].  Tap t's contribution at output row p is
    # z_t[p + (ky-1)*W + (kx-1)], realised with an XLU sublane roll; positions
    # whose source falls outside the image (or in a neighbouring image of the
    # folded batch tile) are zeroed by one precombined edge/corner mask.
    z = jnp.dot(h1.astype(cdt), w2_ref[...],
                preferred_element_type=jnp.float32)          # (rows, 9*planes)
    masks = m_ref[...]                                       # (rows, 8) f32

    acc = None
    for ky in range(3):
        for kx in range(3):
            t = ky * 3 + kx
            off = (ky - 1) * W + (kx - 1)
            zt = z[:, t * planes:(t + 1) * planes]
            if off != 0:
                zt = pltpu.roll(zt, (-off) % rows, axis=0)   # out[p]=z_t[p+off]
            col = _TAP_MASK_COL[t]
            if col is not None:
                zt = zt * masks[:, col:col + 1]
            acc = zt if acc is None else acc + zt
    h2 = jnp.maximum(acc + b2_ref[...], 0.0)                 # bn2 bias + relu

    # ---- conv3 (1x1) -> bn3 (scale folded into w3) + bias -------------------
    h3 = jnp.dot(h2.astype(cdt), w3_ref[...],
                 preferred_element_type=jnp.float32) + b3_ref[...]

    # ---- residual add (downsample is None) + relu ---------------------------
    # Re-read x from the ref; upcast only inside the add (no live f32 copy).
    out = jnp.maximum(h3 + x_ref[0].astype(jnp.float32), 0.0)
    o_ref[0] = out.astype(o_ref.dtype)


def _pick_vmem_limit_bytes():
    cap = 64 * 1024 * 1024          # conservative fallback (v7x physical)
    try:
        info = pltpu.get_tpu_info()
        cap = int(getattr(info, "vmem_capacity_bytes", cap))
    except Exception:
        pass
    # Leave ~1/8 headroom for Mosaic internal scratch (never request 100%).
    return (cap * 7) // 8           # ~112 MiB on v5e/v6e, ~56 MiB on v7x


def _pick_batch_tile(N, HW, Cin, planes, cout, x_itemsize, budget_bytes):
    """Largest divisor of N whose folded working set fits the VMEM budget."""
    per_img = HW * (2 * Cin * x_itemsize          # x block (double-buffered)
                    + 2 * cout * x_itemsize       # out block (double-buffered)
                    + 128 * 4                     # packed masks (lane-padded)
                    + (11 * planes + cout) * 4)   # h1 + z + acc + h3 f32 temps
    bt = 1
    for cand in range(1, N + 1):
        if N % cand == 0 and cand * per_img <= budget_bytes and cand * HW <= 8192:
            bt = cand
    return bt


def bottleneck_pallas(x, w1, s1, b1, w2, s2, b2, w3, s3, b3,
                      *, compute_dtype=jnp.bfloat16, batch_tile=None,
                      vmem_limit_bytes=None):
    """Fused Bottleneck forward (stride=1, downsample=None, inference BN).

    x : (N, H, W, Cin) NHWC activations (f32 or bf16).
    w1: (Cin, planes)          == torch conv1.weight[:, :, 0, 0].T
    w2: (3, 3, planes, planes) == torch conv2.weight.permute(2, 3, 1, 0) (HWIO)
    w3: (planes, 4*planes)     == torch conv3.weight[:, :, 0, 0].T
    s*/b*: folded inference BatchNorm scale / bias per output channel.
    """
    N, H, W, Cin = x.shape
    planes = w1.shape[1]
    cout = w3.shape[1]
    assert Cin == cout, "stride=1 / downsample=None requires inplanes == planes*4"
    HW = H * W
    f32 = jnp.float32
    cdt = compute_dtype

    # Fold BN scales into conv weights (output-channel axis) in f32, then cast
    # once to the MXU compute dtype.  conv2 is packed weight-side:
    #   W2_all[ci, t*planes + co] = w2[ky, kx, ci, co] * s2[co],  t = ky*3+kx.
    w1f = (w1.astype(f32) * s1.astype(f32)[None, :]).astype(cdt)
    w2f = w2.astype(f32) * s2.astype(f32)[None, None, None, :]
    w2all = jnp.transpose(w2f, (2, 0, 1, 3)).reshape(planes, 9 * planes).astype(cdt)
    w3f = (w3.astype(f32) * s3.astype(f32)[None, :]).astype(cdt)
    b1r = b1.astype(f32).reshape(1, planes)
    b2r = b2.astype(f32).reshape(1, planes)
    b3r = b3.astype(f32).reshape(1, cout)

    if vmem_limit_bytes is None:
        vmem_limit_bytes = _pick_vmem_limit_bytes()
    if batch_tile is None:
        batch_tile = _pick_batch_tile(N, HW, Cin, planes, cout,
                                      jnp.dtype(x.dtype).itemsize,
                                      vmem_limit_bytes // 2)
    bt = batch_tile
    assert N % bt == 0, "batch_tile must divide N"
    rows = bt * HW

    # Packed edge/corner validity masks, one (rows, 8) f32 array.
    hh = jnp.repeat(jnp.arange(H, dtype=jnp.int32), W)       # h index per row
    ww = jnp.tile(jnp.arange(W, dtype=jnp.int32), H)         # w index per row
    mt, mb = hh > 0, hh < H - 1
    ml, mr = ww > 0, ww < W - 1
    masks = jnp.stack([mt, mb, ml, mr, mt & ml, mt & mr, mb & ml, mb & mr],
                      axis=1).astype(f32)
    masks = jnp.tile(masks, (bt, 1))                          # (rows, 8)

    # Fold `bt` images into the row (sublane) axis; cross-image (and circular
    # wrap) reads of the rolls are zeroed by the same top/bot masks that
    # implement the zero padding.
    x2 = x.reshape(N // bt, rows, Cin)

    def full_spec(a):
        return pl.BlockSpec(a.shape, lambda n, _nd=a.ndim: (0,) * _nd)

    kernel = functools.partial(_bottleneck_kernel, W=W, planes=planes)

    out = pl.pallas_call(
        kernel,
        out_shape=jax.ShapeDtypeStruct((N // bt, rows, cout), x.dtype),
        grid=(N // bt,),
        in_specs=[
            pl.BlockSpec((1, rows, Cin), lambda n: (n, 0, 0)),
            full_spec(w1f), full_spec(b1r),
            full_spec(w2all), full_spec(b2r),
            full_spec(w3f), full_spec(b3r),
            full_spec(masks),
        ],
        out_specs=pl.BlockSpec((1, rows, cout), lambda n: (n, 0, 0)),
        compiler_params=pltpu.CompilerParams(
            dimension_semantics=("parallel",),
            vmem_limit_bytes=int(vmem_limit_bytes),
        ),
    )(x2, w1f, b1r, w2all, b2r, w3f, b3r, masks)
    return out.reshape(N, H, W, cout)


def bottleneck_ref(x, w1, s1, b1, w2, s2, b2, w3, s3, b3):
    """Pure-JAX reference (NHWC / HWIO) for validation."""
    h = jnp.maximum(jnp.einsum('nhwc,co->nhwo', x, w1) * s1 + b1, 0.0)
    h = lax.conv_general_dilated(h, w2, window_strides=(1, 1), padding='SAME',
                                 dimension_numbers=('NHWC', 'HWIO', 'NHWC'))
    h = jnp.maximum(h * s2 + b2, 0.0)
    h = jnp.einsum('nhwc,co->nhwo', h, w3) * s3 + b3
    return jnp.maximum(h + x, 0.0)


def fold_bn(gamma, beta, mean, var, eps=1e-5):
    scale = gamma / jnp.sqrt(var + eps)
    bias = beta - mean * scale
    return scale, bias


if __name__ == "__main__":
    # Small deterministic config: inplanes = planes * expansion = 32.
    N, H, W = 2, 8, 8
    planes = 8
    inplanes = planes * 4        # 32

    key = jax.random.PRNGKey(0)
    ks = jax.random.split(key, 8)

    x = jax.random.normal(ks[0], (N, H, W, inplanes), jnp.float32)

    # Conv weights already in kernel-friendly layouts (see wrapper docstring).
    w1 = 0.1 * jax.random.normal(ks[1], (inplanes, planes), jnp.float32)
    w2 = 0.1 * jax.random.normal(ks[2], (3, 3, planes, planes), jnp.float32)
    w3 = 0.1 * jax.random.normal(ks[3], (planes, planes * 4), jnp.float32)

    def bn_params(k, c):
        ka, kb, kc, kd = jax.random.split(k, 4)
        gamma = 0.5 + jax.random.uniform(ka, (c,), jnp.float32)
        beta = 0.1 * jax.random.normal(kb, (c,), jnp.float32)
        mean = 0.1 * jax.random.normal(kc, (c,), jnp.float32)
        var = 0.5 + jax.random.uniform(kd, (c,), jnp.float32)
        return fold_bn(gamma, beta, mean, var)

    s1, b1 = bn_params(ks[4], planes)
    s2, b2 = bn_params(ks[5], planes)
    s3, b3 = bn_params(ks[6], planes * 4)

    ref = bottleneck_ref(x, w1, s1, b1, w2, s2, b2, w3, s3, b3)

    # 1) f32 MXU path, one image per grid step (tight tolerance).
    out_f32 = bottleneck_pallas(x, w1, s1, b1, w2, s2, b2, w3, s3, b3,
                                compute_dtype=jnp.float32, batch_tile=1)
    out_f32 = jax.block_until_ready(out_f32)
    assert out_f32.shape == (N, H, W, planes * 4)
    assert jnp.allclose(out_f32, ref, atol=1e-3, rtol=1e-3), \
        f"f32 max err {jnp.max(jnp.abs(out_f32 - ref))}"

    # 2) bf16 MXU path with the whole batch folded into the row axis.
    out_bf16 = bottleneck_pallas(x, w1, s1, b1, w2, s2, b2, w3, s3, b3,
                                 compute_dtype=jnp.bfloat16, batch_tile=2)
    out_bf16 = jax.block_until_ready(out_bf16)
    assert out_bf16.shape == (N, H, W, planes * 4)
    assert jnp.allclose(out_bf16, ref, atol=5e-2, rtol=5e-2), \
        f"bf16 max err {jnp.max(jnp.abs(out_bf16 - ref))}"

    print("KERNEL_OK")
</pallas_src>

<mosaic_0001>
module attributes {stable_mosaic.version = 11 : i64} {
  func.func @_bottleneck_kernel(%arg0: i32, %arg1: memref<1x64x32xf32, #tpu.memory_space<vmem>>, %arg2: memref<32x8xf32, #tpu.memory_space<vmem>>, %arg3: memref<1x8xf32, #tpu.memory_space<vmem>>, %arg4: memref<8x72xf32, #tpu.memory_space<vmem>>, %arg5: memref<1x8xf32, #tpu.memory_space<vmem>>, %arg6: memref<8x32xf32, #tpu.memory_space<vmem>>, %arg7: memref<1x32xf32, #tpu.memory_space<vmem>>, %arg8: memref<64x8xf32, #tpu.memory_space<vmem>>, %arg9: memref<1x64x32xf32, #tpu.memory_space<vmem>>) attributes {dimension_semantics = [#tpu.dimension_semantics<parallel>], iteration_bounds = array<i64: 2>, scalar_prefetch = 0 : i64, scratch_operands = 0 : i64, tpu.core_type = #tpu.core_type<tc>, window_params = [{transform_indices = @transform_0, window_bounds = array<i64: 1, 64, 32>}, {pipeline_mode = #tpu.pipeline_mode<synchronous>, transform_indices = @transform_1, window_bounds = array<i64: 32, 8>}, {pipeline_mode = #tpu.pipeline_mode<synchronous>, transform_indices = @transform_2, window_bounds = array<i64: 1, 8>}, {pipeline_mode = #tpu.pipeline_mode<synchronous>, transform_indices = @transform_3, window_bounds = array<i64: 8, 72>}, {pipeline_mode = #tpu.pipeline_mode<synchronous>, transform_indices = @transform_4, window_bounds = array<i64: 1, 8>}, {pipeline_mode = #tpu.pipeline_mode<synchronous>, transform_indices = @transform_5, window_bounds = array<i64: 8, 32>}, {pipeline_mode = #tpu.pipeline_mode<synchronous>, transform_indices = @transform_6, window_bounds = array<i64: 1, 32>}, {pipeline_mode = #tpu.pipeline_mode<synchronous>, transform_indices = @transform_7, window_bounds = array<i64: 64, 8>}, {transform_indices = @transform_8, window_bounds = array<i64: 1, 64, 32>}]} {
    %c0 = arith.constant 0 : index
    %c0_0 = arith.constant 0 : index
    %c0_1 = arith.constant 0 : index
    %0 = vector.load %arg1[%c0, %c0_0, %c0_1] : memref<1x64x32xf32, #tpu.memory_space<vmem>>, vector<1x64x32xf32>
    %1 = vector.shape_cast %0 : vector<1x64x32xf32> to vector<64x32xf32>
    %c0_2 = arith.constant 0 : index
    %c0_3 = arith.constant 0 : index
    %2 = vector.load %arg2[%c0_2, %c0_3] : memref<32x8xf32, #tpu.memory_space<vmem>>, vector<32x8xf32>
    %cst = arith.constant dense<0.000000e+00> : vector<64x8xf32>
    %3 = tpu.matmul %1, %2, %cst {dimension_numbers = #tpu.dot_dimension_numbers<[1], [0], [0], [1], [0, 0, 1, 1], [], []>} : vector<64x32xf32>, vector<32x8xf32>, vector<64x8xf32> -> vector<64x8xf32>
    %c0_4 = arith.constant 0 : index
    %c0_5 = arith.constant 0 : index
    %4 = vector.load %arg3[%c0_4, %c0_5] : memref<1x8xf32, #tpu.memory_space<vmem>>, vector<1x8xf32>
    %5 = vector.broadcast %4 : vector<1x8xf32> to vector<64x8xf32>
    %6 = arith.addf %3, %5 : vector<64x8xf32>
    %cst_6 = arith.constant 0.000000e+00 : f32
    %7 = vector.broadcast %cst_6 : f32 to vector<64x8xf32>
    %8 = arith.maximumf %6, %7 : vector<64x8xf32>
    %c0_7 = arith.constant 0 : index
    %c0_8 = arith.constant 0 : index
    %9 = vector.load %arg4[%c0_7, %c0_8] : memref<8x72xf32, #tpu.memory_space<vmem>>, vector<8x72xf32>
    %cst_9 = arith.constant dense<0.000000e+00> : vector<64x72xf32>
    %10 = tpu.matmul %8, %9, %cst_9 {dimension_numbers = #tpu.dot_dimension_numbers<[1], [0], [0], [1], [0, 0, 1, 1], [], []>} : vector<64x8xf32>, vector<8x72xf32>, vector<64x72xf32> -> vector<64x72xf32>
    %c0_10 = arith.constant 0 : index
    %c0_11 = arith.constant 0 : index
    %11 = vector.load %arg8[%c0_10, %c0_11] : memref<64x8xf32, #tpu.memory_space<vmem>>, vector<64x8xf32>
    %12 = vector.extract_strided_slice %10 {offsets = [0, 0], sizes = [64, 8], strides = [1, 1]} : vector<64x72xf32> to vector<64x8xf32>
    %c9_i32 = arith.constant 9 : i32
    %13 = tpu.dynamic_rotate %12 by %c9_i32 dim 0 : vector<64x8xf32>, i32 -> vector<64x8xf32>
    %14 = vector.extract_strided_slice %11 {offsets = [0, 4], sizes = [64, 1], strides = [1, 1]} : vector<64x8xf32> to vector<64x1xf32>
    %15 = vector.broadcast %14 : vector<64x1xf32> to vector<64x8xf32>
    %16 = arith.mulf %13, %15 : vector<64x8xf32>
    %17 = vector.extract_strided_slice %10 {offsets = [0, 8], sizes = [64, 8], strides = [1, 1]} : vector<64x72xf32> to vector<64x8xf32>
    %c8_i32 = arith.constant 8 : i32
    %18 = tpu.dynamic_rotate %17 by %c8_i32 dim 0 : vector<64x8xf32>, i32 -> vector<64x8xf32>
    %19 = vector.extract_strided_slice %11 {offsets = [0, 0], sizes = [64, 1], strides = [1, 1]} : vector<64x8xf32> to vector<64x1xf32>
    %20 = vector.broadcast %19 : vector<64x1xf32> to vector<64x8xf32>
    %21 = arith.mulf %18, %20 : vector<64x8xf32>
    %22 = arith.addf %16, %21 : vector<64x8xf32>
    %23 = vector.extract_strided_slice %10 {offsets = [0, 16], sizes = [64, 8], strides = [1, 1]} : vector<64x72xf32> to vector<64x8xf32>
    %c7_i32 = arith.constant 7 : i32
    %24 = tpu.dynamic_rotate %23 by %c7_i32 dim 0 : vector<64x8xf32>, i32 -> vector<64x8xf32>
    %25 = vector.extract_strided_slice %11 {offsets = [0, 5], sizes = [64, 1], strides = [1, 1]} : vector<64x8xf32> to vector<64x1xf32>
    %26 = vector.broadcast %25 : vector<64x1xf32> to vector<64x8xf32>
    %27 = arith.mulf %24, %26 : vector<64x8xf32>
    %28 = arith.addf %22, %27 : vector<64x8xf32>
    %29 = vector.extract_strided_slice %10 {offsets = [0, 24], sizes = [64, 8], strides = [1, 1]} : vector<64x72xf32> to vector<64x8xf32>
    %c1_i32 = arith.constant 1 : i32
    %30 = tpu.dynamic_rotate %29 by %c1_i32 dim 0 : vector<64x8xf32>, i32 -> vector<64x8xf32>
    %31 = vector.extract_strided_slice %11 {offsets = [0, 2], sizes = [64, 1], strides = [1, 1]} : vector<64x8xf32> to vector<64x1xf32>
    %32 = vector.broadcast %31 : vector<64x1xf32> to vector<64x8xf32>
    %33 = arith.mulf %30, %32 : vector<64x8xf32>
    %34 = arith.addf %28, %33 : vector<64x8xf32>
    %35 = vector.extract_strided_slice %10 {offsets = [0, 32], sizes = [64, 8], strides = [1, 1]} : vector<64x72xf32> to vector<64x8xf32>
    %36 = arith.addf %34, %35 : vector<64x8xf32>
    %37 = vector.extract_strided_slice %10 {offsets = [0, 40], sizes = [64, 8], strides = [1, 1]} : vector<64x72xf32> to vector<64x8xf32>
    %c63_i32 = arith.constant 63 : i32
    %38 = tpu.dynamic_rotate %37 by %c63_i32 dim 0 : vector<64x8xf32>, i32 -> vector<64x8xf32>
    %39 = vector.extract_strided_slice %11 {offsets = [0, 3], sizes = [64, 1], strides = [1, 1]} : vector<64x8xf32> to vector<64x1xf32>
    %40 = vector.broadcast %39 : vector<64x1xf32> to vector<64x8xf32>
    %41 = arith.mulf %38, %40 : vector<64x8xf32>
    %42 = arith.addf %36, %41 : vector<64x8xf32>
    %43 = vector.extract_strided_slice %10 {offsets = [0, 48], sizes = [64, 8], strides = [1, 1]} : vector<64x72xf32> to vector<64x8xf32>
    %c57_i32 = arith.constant 57 : i32
    %44 = tpu.dynamic_rotate %43 by %c57_i32 dim 0 : vector<64x8xf32>, i32 -> vector<64x8xf32>
    %45 = vector.extract_strided_slice %11 {offsets = [0, 6], sizes = [64, 1], strides = [1, 1]} : vector<64x8xf32> to vector<64x1xf32>
    %46 = vector.broadcast %45 : vector<64x1xf32> to vector<64x8xf32>
    %47 = arith.mulf %44, %46 : vector<64x8xf32>
    %48 = arith.addf %42, %47 : vector<64x8xf32>
    %49 = vector.extract_strided_slice %10 {offsets = [0, 56], sizes = [64, 8], strides = [1, 1]} : vector<64x72xf32> to vector<64x8xf32>
    %c56_i32 = arith.constant 56 : i32
    %50 = tpu.dynamic_rotate %49 by %c56_i32 dim 0 : vector<64x8xf32>, i32 -> vector<64x8xf32>
    %51 = vector.extract_strided_slice %11 {offsets = [0, 1], sizes = [64, 1], strides = [1, 1]} : vector<64x8xf32> to vector<64x1xf32>
    %52 = vector.broadcast %51 : vector<64x1xf32> to vector<64x8xf32>
    %53 = arith.mulf %50, %52 : vector<64x8xf32>
    %54 = arith.addf %48, %53 : vector<64x8xf32>
    %55 = vector.extract_strided_slice %10 {offsets = [0, 64], sizes = [64, 8], strides = [1, 1]} : vector<64x72xf32> to vector<64x8xf32>
    %c55_i32 = arith.constant 55 : i32
    %56 = tpu.dynamic_rotate %55 by %c55_i32 dim 0 : vector<64x8xf32>, i32 -> vector<64x8xf32>
    %57 = vector.extract_strided_slice %11 {offsets = [0, 7], sizes = [64, 1], strides = [1, 1]} : vector<64x8xf32> to vector<64x1xf32>
    %58 = vector.broadcast %57 : vector<64x1xf32> to vector<64x8xf32>
    %59 = arith.mulf %56, %58 : vector<64x8xf32>
    %60 = arith.addf %54, %59 : vector<64x8xf32>
    %c0_12 = arith.constant 0 : index
    %c0_13 = arith.constant 0 : index
    %61 = vector.load %arg5[%c0_12, %c0_13] : memref<1x8xf32, #tpu.memory_space<vmem>>, vector<1x8xf32>
    %62 = vector.broadcast %61 : vector<1x8xf32> to vector<64x8xf32>
    %63 = arith.addf %60, %62 : vector<64x8xf32>
    %cst_14 = arith.constant 0.000000e+00 : f32
    %64 = vector.broadcast %cst_14 : f32 to vector<64x8xf32>
    %65 = arith.maximumf %63, %64 : vector<64x8xf32>
    %c0_15 = arith.constant 0 : index
    %c0_16 = arith.constant 0 : index
    %66 = vector.load %arg6[%c0_15, %c0_16] : memref<8x32xf32, #tpu.memory_space<vmem>>, vector<8x32xf32>
    %cst_17 = arith.constant dense<0.000000e+00> : vector<64x32xf32>
    %67 = tpu.matmul %65, %66, %cst_17 {dimension_numbers = #tpu.dot_dimension_numbers<[1], [0], [0], [1], [0, 0, 1, 1], [], []>} : vector<64x8xf32>, vector<8x32xf32>, vector<64x32xf32> -> vector<64x32xf32>
    %c0_18 = arith.constant 0 : index
    %c0_19 = arith.constant 0 : index
    %68 = vector.load %arg7[%c0_18, %c0_19] : memref<1x32xf32, #tpu.memory_space<vmem>>, vector<1x32xf32>
    %69 = vector.broadcast %68 : vector<1x32xf32> to vector<64x32xf32>
    %70 = arith.addf %67, %69 : vector<64x32xf32>
    %c0_20 = arith.constant 0 : index
    %c0_21 = arith.constant 0 : index
    %c0_22 = arith.constant 0 : index
    %71 = vector.load %arg1[%c0_20, %c0_21, %c0_22] : memref<1x64x32xf32, #tpu.memory_space<vmem>>, vector<1x64x32xf32>
    %72 = vector.shape_cast %71 : vector<1x64x32xf32> to vector<64x32xf32>
    %73 = arith.addf %70, %72 : vector<64x32xf32>
    %cst_23 = arith.constant 0.000000e+00 : f32
    %74 = vector.broadcast %cst_23 : f32 to vector<64x32xf32>
    %75 = arith.maximumf %73, %74 : vector<64x32xf32>
    %c0_24 = arith.constant 0 : index
    %c0_25 = arith.constant 0 : index
    %c0_26 = arith.constant 0 : index
    %76 = vector.load %arg9[%c0_24, %c0_25, %c0_26] : memref<1x64x32xf32, #tpu.memory_space<vmem>>, vector<1x64x32xf32>
    %77 = vector.shape_cast %76 : vector<1x64x32xf32> to vector<64x32xf32>
    %78 = vector.shape_cast %75 : vector<64x32xf32> to vector<1x64x32xf32>
    tpu.vector_store %arg9[%c0_24, %c0_25, %c0_26], %78 {strides = array<i32>} : memref<1x64x32xf32, #tpu.memory_space<vmem>>, vector<1x64x32xf32>,
    return
  }
  func.func @transform_0(%arg0: i32) -> (i32, i32, i32) {
    %c0_i32 = arith.constant 0 : i32
    %c0_i32_0 = arith.constant 0 : i32
    %c0_i32_1 = arith.constant 0 : i32
    return %arg0, %c0_i32, %c0_i32_0 : i32, i32, i32
  }
  func.func @transform_1(%arg0: i32) -> (i32, i32) {
    %c0_i32 = arith.constant 0 : i32
    %c0_i32_0 = arith.constant 0 : i32
    %c0_i32_1 = arith.constant 0 : i32
    return %c0_i32, %c0_i32_0 : i32, i32
  }
  func.func @transform_2(%arg0: i32) -> (i32, i32) {
    %c0_i32 = arith.constant 0 : i32
    %c0_i32_0 = arith.constant 0 : i32
    %c0_i32_1 = arith.constant 0 : i32
    return %c0_i32, %c0_i32_0 : i32, i32
  }
  func.func @transform_3(%arg0: i32) -> (i32, i32) {
    %c0_i32 = arith.constant 0 : i32
    %c0_i32_0 = arith.constant 0 : i32
    %c0_i32_1 = arith.constant 0 : i32
    return %c0_i32, %c0_i32_0 : i32, i32
  }
  func.func @transform_4(%arg0: i32) -> (i32, i32) {
    %c0_i32 = arith.constant 0 : i32
    %c0_i32_0 = arith.constant 0 : i32
    %c0_i32_1 = arith.constant 0 : i32
    return %c0_i32, %c0_i32_0 : i32, i32
  }
  func.func @transform_5(%arg0: i32) -> (i32, i32) {
    %c0_i32 = arith.constant 0 : i32
    %c0_i32_0 = arith.constant 0 : i32
    %c0_i32_1 = arith.constant 0 : i32
    return %c0_i32, %c0_i32_0 : i32, i32
  }
  func.func @transform_6(%arg0: i32) -> (i32, i32) {
    %c0_i32 = arith.constant 0 : i32
    %c0_i32_0 = arith.constant 0 : i32
    %c0_i32_1 = arith.constant 0 : i32
    return %c0_i32, %c0_i32_0 : i32, i32
  }
  func.func @transform_7(%arg0: i32) -> (i32, i32) {
    %c0_i32 = arith.constant 0 : i32
    %c0_i32_0 = arith.constant 0 : i32
    %c0_i32_1 = arith.constant 0 : i32
    return %c0_i32, %c0_i32_0 : i32, i32
  }
  func.func @transform_8(%arg0: i32) -> (i32, i32, i32) {
    %c0_i32 = arith.constant 0 : i32
    %c0_i32_0 = arith.constant 0 : i32
    %c0_i32_1 = arith.constant 0 : i32
    return %arg0, %c0_i32, %c0_i32_0 : i32, i32, i32
  }
}

</mosaic_0001>

<bundles_post_ra>
// kernel: tpu_custom_call.1
= control target key start
LH: loop header
LB: loop body
LE: loop exit
PB: predicated region body
PF: predicated region fallthrough
CT: control target
= control target key end

     0   :  { %s1784_s27 = smov 0   ;;  %s2673_s0 = inlined_call_operand.vmem [shape: f32[2,64,32], index: 0, kind: input, shape index: {}]   ;;  %s2674_s1 = inlined_call_operand.vmem [shape: f32[32,8], index: 1, kind: input, shape index: {}]   ;;  %s2675_s2 = inlined_call_operand.vmem [shape: f32[1,8], index: 2, kind: input, shape index: {}]   ;;  %s2676_s3 = inlined_call_operand.vmem [shape: f32[8,72], index: 3, kind: input, shape index: {}]   ;;  %s2677_s4 = inlined_call_operand.vmem [shape: f32[1,8], index: 4, kind: input, shape index: {}]   ;;  %s2678_s5 = inlined_call_operand.vmem [shape: f32[8,32], index: 5, kind: input, shape index: {}]   ;;  %s2679_s6 = inlined_call_operand.vmem [shape: f32[1,32], index: 6, kind: input, shape index: {}]   ;;  %s2680_s7 = inlined_call_operand.vmem [shape: f32[64,8], index: 7, kind: input, shape index: {}]   ;;  %s2681_s8 = inlined_call_operand.vmem [shape: f32[2,64,32], index: 8, kind: output, shape index: {}]  }
   0x1 LB: > { %s1533_s28 = sadd.s32 4294967295, %s1721_s27   ;;  %p1537_p0 = scmp.ge.s32.totalorder %s1721_s27, 1  ;;  %s1721_s27 = sphi %s1784_s27, %s18_s27  }
   0x2   : > { %p262_p1 = scmp.lt.s32.totalorder %s1721_s27, 3 }
   0x4   : > { %p263_p2 = pnand %p1537_p0, %p262_p1 }
   0x6   : > { %266 = sbr.rel (%p263_p2) target bundleno = 897 (0x381), region = 52 }
   0xb   : > { %v317_v0 = vld [vmem:[%s2674_s1 + $0x18] sm:$0xff]  ;;  %v316_v1 = vld [vmem:[%s2674_s1 + $0x10] sm:$0xff]  ;;  %p296_p3 = scmp.lt.s32.totalorder %s1533_s28, 1  ;;  %v463_v2 = vld [vmem:[%s2676_s3] sm:$0xff]  ;;  %vm325_vm0 = vcmask 261120   ;;  %v1723_v14 = vmov 4  }
   0xc   : > { %1603 = vmatprep.subr.mxu0 %v317_v0  ;;  %v315_v3 = vld [vmem:[%s2674_s1 + $0x8] sm:$0xff]  ;;  %1651 = vmatprep.subr.mxu1 %v463_v2  ;;  %v314_v4 = vld [vmem:[%s2674_s1] sm:$0xff]  ;;  %v1836_v13 = vld [vmem:[%s2680_s7 + $0x10] sm:$0xff]  ;;  %v1724_v22 = vmov 0   ;;  %v1725_v23 = vmov 5   ;;  %v1726_v24 = vmov 2  }
   0xd   : > { %1604 = vmatpush3.msra.mxu0 %v317_v0  ;;  %s2775_s28 = smov (!%p296_p3, %s1533_s28), 1  ;;  %1652 = vmatpush3.msra.mxu1 %v463_v2  ;;  %v1842_v15 = vld [vmem:[%s2680_s7] sm:$0xff]  ;;  %v1847_v16 = vld [vmem:[%s2680_s7 + $0x18] sm:$0xff]  ;;  %v1854_v17 = vld [vmem:[%s2680_s7 + $0x8] sm:$0xff]  ;;  %v1727_v25 = vmov 3   ;;  %v1728_v26 = vmov 6  }
   0xe   : > { %1605 = vmatprep.subr.mxu0 %v316_v1  ;;  %s1571_s17 = sshll.u32 %s2775_s28, 6  ;;  %1678 = vset.pattern.permute.xlu1 %v1723_v14  ;;  %v1859_v18 = vld [vmem:[%s2680_s7 + $0x28] sm:$0xff]  ;;  %v1866_v19 = vld [vmem:[%s2680_s7 + $0x20] sm:$0xff]  ;;  %v1871_v20 = vld [vmem:[%s2680_s7 + $0x38] sm:$0xff]  ;;  %v1729_v27 = vmov 1   ;;  %vm464_vm1 = vcmask 64512  }
   0xf   : > { %1606 = vmatpush3.msra.mxu0 %v316_v1  ;;  %s1815_s20 = scalar_lea.vmem %s2673_s0, %s1571_s17  ;;  %1677 = vset.pattern.permute.xlu0 %v1723_v14  ;;  %v1878_v21 = vld [vmem:[%s2680_s7 + $0x30] sm:$0xff]  ;;  %v1542_v28 = vld [vmem:[%s2675_s2] ss:$0 sm:$0xff]  ;;  %v1730_v36 = vmov 7   ;;  %s1731_s21 = smov 112  }
  0x10   : > { %1607 = vmatprep.subr.mxu0 %v315_v3  ;;  %v306_v5 = vld [vmem:[%s1815_s20] sm:$0xff]  ;;  %v307_v6 = vld [vmem:[%s1815_s20 + $0x8] sm:$0xff]  ;;  %v308_v7 = vld [vmem:[%s1815_s20 + $0x10] sm:$0xff]  ;;  %633 = vperm.xlu1 %1678, %v1836_v13   ;;  %s1732_s22 = smov 120   ;;  %s1733_s23 = smov 104  }
  0x11   : > { %1608 = vmatpush3.msra.mxu0 %v315_v3  ;;  %1611 = vmatprep.mubr.msk.f32.mxu0 %vm325_vm0, %v306_v5  ;;  %v309_v8 = vld [vmem:[%s1815_s20 + $0x18] sm:$0xff]  ;;  %v310_v9 = vld [vmem:[%s1815_s20 + $0x20] sm:$0xff]  ;;  %v311_v10 = vld [vmem:[%s1815_s20 + $0x28] sm:$0xff]  ;;  %s1734_s24 = smov 80   ;;  %s1735_s25 = smov 88  }
  0x12   : > { %1609 = vmatprep.subr.mxu0 %v314_v4  ;;  %v312_v11 = vld [vmem:[%s1815_s20 + $0x30] sm:$0xff]  ;;  %v313_v12 = vld [vmem:[%s1815_s20 + $0x38] sm:$0xff]  ;;  %623 = vperm.xlu0 %1677, %v1842_v15   ;;  %s1736_s26 = smov 96   ;;  %s1737_s29 = smov 64  }
  0x13   : > { %1610 = vmatpush3.msra.mxu0 %v314_v4  ;;  %s1738_s30 = smov 72   ;;  %s2645_s18 = scalar_lea.vmem %s2681_s8, %s1571_s17 }
  0x14   : > { %1612 = vmatmul.mubr.msk.f32.vlgmr.msra.gmra.mxu0 %vm325_vm0, %v307_v6  ;;  %1623 = vmatprep.subr.mxu0 %v463_v2 }
  0x15   : > { %1614 = vmatprep.mubr.msk.f32.mxu0 %vm325_vm0, %v308_v7  ;;  %1624 = vmatpush3.msra.mxu0 %v463_v2 }
  0x16   : > { %638 = vperm.xlu1 %1678, %v1847_v16   ;;  %628 = vperm.xlu0 %1677, %v1854_v17  }
  0x18   : > { %1615 = vmatmul.mubr.msk.f32.gmra.mxu0 %vm325_vm0, %v309_v8 }
  0x19   : > { %1617 = vmatprep.mubr.msk.f32.mxu0 %vm325_vm0, %v310_v9 }
  0x1a   : > { %648 = vperm.xlu1 %1678, %v1859_v18   ;;  %643 = vperm.xlu0 %1677, %v1866_v19  }
  0x1c   : > { %1618 = vmatmul.mubr.msk.f32.gmra.mxu0 %vm325_vm0, %v311_v10 }
  0x1d   : > { %1620 = vmatprep.mubr.msk.f32.mxu0 %vm325_vm0, %v312_v11 }
  0x1e   : > { %658 = vperm.xlu1 %1678, %v1871_v20   ;;  %653 = vperm.xlu0 %1677, %v1878_v21  }
  0x20   : > { %1621 = vmatmul.mubr.msk.f32.gmra.mxu0 %vm325_vm0, %v313_v12 }
  0x22   : > { %1680 = vset.pattern.permute.xlu1 %v1724_v22  ;;  %1679 = vset.pattern.permute.xlu0 %v1724_v22 }
  0x23   : > { %706 = vperm.xlu1 %1680, %v1854_v17   ;;  %702 = vperm.xlu0 %1679, %v1842_v15  }
  0x27   : > { %710 = vperm.xlu1 %1680, %v1836_v13   ;;  %714 = vperm.xlu0 %1679, %v1847_v16  }
  0x2b   : > { %718 = vperm.xlu1 %1680, %v1866_v19   ;;  %722 = vperm.xlu0 %1679, %v1859_v18  }
  0x2f   : > { %726 = vperm.xlu1 %1680, %v1878_v21   ;;  %730 = vperm.xlu0 %1679, %v1871_v20  }
  0x33   : > { %1681 = vset.pattern.permute.xlu1 %v1725_v23  ;;  %1682 = vset.pattern.permute.xlu0 %v1725_v23 }
  0x34   : > { %791 = vperm.xlu1 %1681, %v1842_v15   ;;  %795 = vperm.xlu0 %1682, %v1854_v17  }
  0x38   : > { %1683 = vset.pattern.permute.xlu1 %v1726_v24  ;;  %807 = vperm.xlu0 %1682, %v1866_v19  }
  0x39   : > { %879 = vperm.xlu1 %1683, %v1842_v15  }
  0x3c   : > { %811 = vperm.xlu0 %1682, %v1859_v18  }
  0x3d   : > { %1684 = vset.pattern.permute.xlu1 %v1725_v23 }
  0x3e   : > { %799 = vperm.xlu1 %1684, %v1836_v13  }
  0x40   : > { %815 = vperm.xlu0 %1682, %v1878_v21  }
  0x42   : > { %803 = vperm.xlu1 %1684, %v1847_v16  }
  0x44   : > { %1691 = vset.pattern.permute.xlu0 %v1726_v24 }
  0x45   : > { %883 = vperm.xlu0 %1691, %v1854_v17  }
  0x46   : > { %1685 = vset.pattern.permute.xlu1 %v1726_v24 }
  0x47   : > { %887 = vperm.xlu1 %1685, %v1836_v13  }
  0x49   : > { %903 = vperm.xlu0 %1691, %v1878_v21  }
  0x4b   : > { %891 = vperm.xlu1 %1685, %v1847_v16  }
  0x4d   : > { %907 = vperm.xlu0 %1691, %v1871_v20  }
  0x4f   : > { %1686 = vset.pattern.permute.xlu1 %v1727_v25 }
  0x50   : > { %1003 = vperm.xlu1 %1686, %v1854_v17  }
  0x51   : > { %1696 = vset.pattern.permute.xlu0 %v1727_v25 }
  0x52   : > { %999 = vperm.xlu0 %1696, %v1842_v15  }
  0x54   : > { %1687 = vset.pattern.permute.xlu1 %v1728_v26 }
  0x55   : > { %1087 = vperm.xlu1 %1687, %v1842_v15  }
  0x56   : > { %1007 = vperm.xlu0 %1696, %v1836_v13  }
  0x59   : > { %1091 = vperm.xlu1 %1687, %v1854_v17  }
  0x5a   : > { %1027 = vperm.xlu0 %1696, %v1871_v20  }
  0x5d   : > { %1688 = vset.pattern.permute.xlu1 %v1726_v24 }
  0x5e   : > { %895 = vperm.xlu1 %1688, %v1866_v19   ;;  %1700 = vset.pattern.permute.xlu0 %v1728_v26 }
  0x5f   : > { %1103 = vperm.xlu0 %1700, %v1866_v19  }
  0x62   : > { %899 = vperm.xlu1 %1688, %v1859_v18  }
  0x63   : > { %1115 = vperm.xlu0 %1700, %v1871_v20  }
  0x66   : > { %1689 = vset.pattern.permute.xlu1 %v1727_v25 }
  0x67   : > { %1011 = vperm.xlu1 %1689, %v1847_v16   ;;  %1703 = vset.pattern.permute.xlu0 %v1729_v27 }
  0x68   : > { %1159 = vperm.xlu0 %1703, %v1842_v15  }
  0x6b   : > { %1690 = vset.pattern.permute.xlu1 %v1729_v27 }
  0x6c   : > { %1163 = vperm.xlu1 %1690, %v1854_v17   ;;  %1167 = vperm.xlu0 %1703, %v1836_v13  }
  0x70   : > { %1692 = vset.pattern.permute.xlu1 %v1728_v26  ;;  %1171 = vperm.xlu0 %1703, %v1847_v16  }
  0x71   : > { %1095 = vperm.xlu1 %1692, %v1836_v13  }
  0x74   : > { %1175 = vperm.xlu0 %1703, %v1866_v19  }
  0x75   : > { %1693 = vset.pattern.permute.xlu1 %v1725_v23 }
  0x76   : > { %819 = vperm.xlu1 %1693, %v1871_v20  }
  0x78   : > { %1179 = vperm.xlu0 %1703, %v1859_v18  }
  0x7a   : > { %1694 = vset.pattern.permute.xlu1 %v1728_v26 }
  0x7b   : > { %1099 = vperm.xlu1 %1694, %v1847_v16  }
  0x7c   : > { %1183 = vperm.xlu0 %1703, %v1878_v21  }
  0x7f   : > { %1695 = vset.pattern.permute.xlu1 %v1727_v25 }
  0x80   : > { %1015 = vperm.xlu1 %1695, %v1866_v19   ;;  %1704 = vset.pattern.permute.xlu0 %v1730_v36 }
  0x81   : > { %1247 = vperm.xlu0 %1704, %v1842_v15  }
  0x84   : > { %1019 = vperm.xlu1 %1695, %v1859_v18  }
  0x85   : > { %1251 = vperm.xlu0 %1704, %v1854_v17  }
  0x88   : > { %1697 = vset.pattern.permute.xlu1 %v1730_v36 }
  0x89   : > { %1255 = vperm.xlu1 %1697, %v1836_v13   ;;  %1259 = vperm.xlu0 %1704, %v1847_v16  }
  0x8b   : > { %v1961_v54 = vpop.permute.xlu1 %633 }
  0x8d   : > { %1698 = vset.pattern.permute.xlu1 %v1728_v26  ;;  %v1969_v58 = vpop.permute.xlu0 %623 }
  0x8e   : > { %1107 = vperm.xlu1 %1698, %v1859_v18  }
  0x91   : > { %v1963_v55 = vpop.permute.xlu1 %638  ;;  %v1973_v60 = vpop.permute.xlu0 %628 }
  0x92   : > { %1699 = vset.pattern.permute.xlu1 %v1727_v25 }
  0x93   : > { %1023 = vperm.xlu1 %1699, %v1878_v21  }
  0x95   : > { %v1965_v56 = vpop.permute.xlu1 %648  ;;  %v1977_v62 = vpop.permute.xlu0 %643 }
  0x97   : > { %1701 = vset.pattern.permute.xlu1 %v1728_v26 }
  0x98   : > { %1111 = vperm.xlu1 %1701, %v1878_v21  }
  0x99   : > { %v1967_v57 = vpop.permute.xlu1 %658  ;;  %v1981_v0 = vpop.permute.xlu0 %653 }
  0x9a   : > { %2693 = vst [vmem:[#allocation2_spill] sm:$0xff] %v1967_v57 }
  0x9c   : > { %1702 = vset.pattern.permute.xlu1 %v1730_v36 }
  0x9d   : > { %1263 = vperm.xlu1 %1702, %v1866_v19  }
  0x9e   : > { %v1971_v59 = vpop.permute.xlu1 %706  ;;  %v1985_v2 = vpop.permute.xlu0 %702 }
  0xa1   : > { %1267 = vperm.xlu1 %1702, %v1859_v18  }
  0xa2   : > { %v1975_v61 = vpop.permute.xlu1 %710  ;;  %v1989_v4 = vpop.permute.xlu0 %714 }
  0xa5   : > { %1705 = vset.pattern.permute.xlu1 %v1729_v27 }
  0xa6   : > { %1187 = vperm.xlu1 %1705, %v1871_v20   ;;  %v1979_v63 = vpop.permute.xlu1 %718  ;;  %v1993_v6 = vpop.permute.xlu0 %722 }
  0xa7   : > { %2695 = vst [vmem:[#allocation4_spill] sm:$0xff] %v1993_v6 }
  0xaa   : > { %1706 = vset.pattern.permute.xlu1 %v1730_v36  ;;  %v1983_v1 = vpop.permute.xlu1 %726  ;;  %v1997_v8 = vpop.permute.xlu0 %730 }
  0xab   : > { %1271 = vperm.xlu1 %1706, %v1878_v21   ;;  %2694 = vst [vmem:[#allocation3_spill] sm:$0xff] %v1983_v1  ;;  %2696 = vst [vmem:[#allocation5_spill] sm:$0xff] %v1997_v8 }
  0xaf   : > { %v1987_v3 = vpop.permute.xlu1 %791  ;;  %v2001_v10 = vpop.permute.xlu0 %795 }
  0xb3   : > { %v2005_v12 = vpop.permute.xlu0 %807 }
  0xb4   : > { %v1991_v5 = vpop.permute.xlu1 %879 }
  0xb7   : > { %v2017_v16 = vpop.permute.xlu0 %811 }
  0xb8   : > { %2697 = vst [vmem:[#allocation6_spill] sm:$0xff] %v2017_v16 }
  0xb9   : > { %v1995_v7 = vpop.permute.xlu1 %799 }
  0xbb   : > { %v2025_v18 = vpop.permute.xlu0 %815 }
  0xbc   : > { %2699 = vst [vmem:[#allocation8_spill] sm:$0xff] %v2025_v18 }
  0xbd   : > { %v1999_v9 = vpop.permute.xlu1 %803 }
  0xc0   : > { %v2039_v22 = vpop.permute.xlu0 %883 }
  0xc2   : > { %v2003_v11 = vpop.permute.xlu1 %887 }
  0xc4   : > { %v2047_v24 = vpop.permute.xlu0 %903 }
  0xc5   : > { %2700 = vst [vmem:[#allocation9_spill] sm:$0xff] %v2047_v24 }
  0xc6   : > { %v2007_v13 = vpop.permute.xlu1 %891 }
  0xc8   : > { %v2061_v27 = vpop.permute.xlu0 %907 }
  0xc9   : > { %2702 = vst [vmem:[#allocation11_spill] sm:$0xff] %v2061_v27 }
  0xcb   : > { %v2015_v15 = vpop.permute.xlu1 %1003 }
  0xd0   : > { %v2023_v17 = vpop.permute.xlu1 %1087 }
  0xd1   : > { %2698 = vst [vmem:[#allocation7_spill] sm:$0xff] %v2023_v17 }
  0xd4   : > { %v1613_v29 = vpop.f32.mrf.mxu0  ;;  %v2037_v21 = vpop.permute.xlu1 %1091 }
  0xd5   : > { %v422_v30 = vadd.f32 %v1613_v29, %v1542_v28  ;;  %v2069_v29 = vpop.permute.xlu0 %999 }
  0xd6   : > { %v416_v31 = vpop.f32.mrf.mxu0  ;;  %2703 = vst [vmem:[#allocation12_spill] sm:$0xff] %v2069_v29 }
  0xd7   : > { %v417_v32 = vadd.f32 %v1542_v28, %v416_v31  ;;  %v456_v37 = vmax.f32 %v422_v30, 0.0 }
  0xd8   : > { %v1616_v33 = vpop.f32.mrf.mxu0 }
  0xd9   : > { %v455_v34 = vmax.f32 %v417_v32, 0.0  ;;  %v432_v35 = vadd.f32 %v1616_v33, %v1542_v28  ;;  %v2045_v23 = vpop.permute.xlu1 %895  ;;  %v2083_v32 = vpop.permute.xlu0 %1007 }
  0xda   : > { %v426_v38 = vpop.f32.mrf.mxu0 }
  0xdb   : > { %v427_v39 = vadd.f32 %v1542_v28, %v426_v38  ;;  %1625 = vmatprep.mubr.msk.f32.mxu0 %vm464_vm1, %v455_v34  ;;  %v458_v40 = vmax.f32 %v432_v35, 0.0 }
  0xdc   : > { %v1619_v41 = vpop.f32.mrf.mxu0  ;;  %1626 = vmatmul.mubr.msk.f32.vlgmr.msra.gmra.mxu0 %vm464_vm1, %v456_v37 }
  0xdd   : > { %v457_v42 = vmax.f32 %v427_v39, 0.0  ;;  %v442_v43 = vadd.f32 %v1619_v41, %v1542_v28  ;;  %v2059_v26 = vpop.permute.xlu1 %899  ;;  %v2091_v34 = vpop.permute.xlu0 %1027 }
  0xde   : > { %v436_v44 = vpop.f32.mrf.mxu0  ;;  %2701 = vst [vmem:[#allocation10_spill] sm:$0xff] %v2059_v26  ;;  %2704 = vst [vmem:[#allocation13_spill] sm:$0xff] %v2091_v34 }
  0xdf   : > { %v437_v45 = vadd.f32 %v1542_v28, %v436_v44  ;;  %1628 = vmatprep.mubr.msk.f32.mxu1 %vm464_vm1, %v457_v42  ;;  %v460_v46 = vmax.f32 %v442_v43, 0.0 }
  0xe0   : > { %v1622_v47 = vpop.f32.mrf.mxu0  ;;  %1629 = vmatmul.mubr.msk.f32.vlgmr.msra.gmra.mxu1 %vm464_vm1, %v458_v40 }
  0xe1   : > { %v459_v48 = vmax.f32 %v437_v45, 0.0  ;;  %v452_v49 = vadd.f32 %v1622_v47, %v1542_v28  ;;  %v2107_v38 = vpop.permute.xlu0 %1103 }
  0xe2   : > { %v446_v50 = vpop.f32.mrf.mxu0  ;;  %2706 = vst [vmem:[#allocation15_spill] sm:$0xff] %v2107_v38 }
  0xe3   : > { %v447_v51 = vadd.f32 %v1542_v28, %v446_v50  ;;  %1631 = vmatprep.mubr.msk.f32.mxu1 %vm464_vm1, %v459_v48  ;;  %v462_v52 = vmax.f32 %v452_v49, 0.0  ;;  %v2067_v28 = vpop.permute.xlu1 %1011 }
  0xe4   : > { %1632 = vmatmul.mubr.msk.f32.gmra.mxu1 %vm464_vm1, %v460_v46 }
  0xe5   : > { %v461_v53 = vmax.f32 %v447_v51, 0.0  ;;  %v2115_v40 = vpop.permute.xlu0 %1115 }
  0xe6   : > { %2707 = vst [vmem:[#allocation16_spill] sm:$0xff] %v2115_v40 }
  0xe7   : > { %1634 = vmatprep.mubr.msk.f32.mxu1 %vm464_vm1, %v461_v53  ;;  %v2077_v31 = vpop.permute.xlu1 %1163 }
  0xe8   : > { %1635 = vmatmul.mubr.msk.f32.gmra.mxu1 %vm464_vm1, %v462_v52 }
  0xe9   : > { %v2127_v42 = vpop.permute.xlu0 %1159 }
  0xec   : > { %v2089_v33 = vpop.permute.xlu1 %1095 }
  0xed   : > { %v2135_v44 = vpop.permute.xlu0 %1167 }
  0xf1   : > { %v2099_v36 = vpop.permute.xlu1 %819  ;;  %v2149_v47 = vpop.permute.xlu0 %1171 }
  0xf2   : > { %2705 = vst [vmem:[#allocation14_spill] sm:$0xff] %v2099_v36  ;;  %2710 = vst [vmem:[#allocation19_spill] sm:$0xff] %v2149_v47 }
  0xf5   : > { %v2157_v49 = vpop.permute.xlu0 %1175 }
  0xf6   : > { %v2113_v39 = vpop.permute.xlu1 %1099  ;;  %2712 = vst [vmem:[#allocation21_spill] sm:$0xff] %v2157_v49 }
  0xf9   : > { %v2171_v52 = vpop.permute.xlu0 %1179 }
  0xfa   : > { %2714 = vst [vmem:[#allocation23_spill] sm:$0xff] %v2171_v52 }
  0xfb   : > { %v2121_v41 = vpop.permute.xlu1 %1015 }
  0xfc   : > { %2708 = vst [vmem:[#allocation17_spill] sm:$0xff] %v2121_v41 }
  0xff   : > { %v2133_v43 = vpop.permute.xlu1 %1019 }
 0x100   : > { %2709 = vst [vmem:[#allocation18_spill] sm:$0xff] %v2133_v43 }
 0x104   : > { %v2143_v46 = vpop.permute.xlu1 %1255 }
 0x109   : > { %v2151_v48 = vpop.permute.xlu1 %1107 }
 0x10a   : > { %2711 = vst [vmem:[#allocation20_spill] sm:$0xff] %v2151_v48  ;;  %v2178_v48 = vpop.permute.xlu0 %1183 }
 0x10b   : > { %2716 = vst [vmem:[#allocation25_spill] sm:$0xff] %v2178_v48 }
 0x10e   : > { %v2165_v51 = vpop.permute.xlu1 %1023 }
 0x10f   : > { %2713 = vst [vmem:[#allocation22_spill] sm:$0xff] %v2165_v51 }
 0x113   : > { %v2173_v53 = vpop.permute.xlu1 %1111 }
 0x114   : > { %2715 = vst [vmem:[#allocation24_spill] sm:$0xff] %v2173_v53  ;;  %v2190_v53 = vpop.permute.xlu0 %1247 }
 0x115   : > { %2718 = vst [vmem:[#allocation27_spill] sm:$0xff] %v2190_v53 }
 0x118   : > { %v2180_v24 = vpop.permute.xlu1 %1263 }
 0x119   : > { %2717 = vst [vmem:[#allocation26_spill] sm:$0xff] %v2180_v24  ;;  %v2198_v24 = vpop.permute.xlu0 %1251 }
 0x11c   : > { %v2192_v51 = vpop.permute.xlu1 %1267 }
 0x11d   : > { %2719 = vst [vmem:[#allocation28_spill] sm:$0xff] %v2192_v51  ;;  %v2208_v43 = vpop.permute.xlu0 %1259 }
 0x11e   : > { %2722 = vst [vmem:[#allocation31_spill] sm:$0xff] %v2208_v43 }
 0x121   : > { %v2196_v48 = vpop.permute.xlu1 %1187 }
 0x122   : > { %2720 = vst [vmem:[#allocation29_spill] sm:$0xff] %v2196_v48 }
 0x126   : > { %v2206_v40 = vpop.permute.xlu1 %1271 }
 0x127   : > { %2721 = vst [vmem:[#allocation30_spill] sm:$0xff] %v2206_v40 }
 0x19c   : > { %v2009_v14 = vpop.f32.mrf.mxu0 }
 0x19d   : > { %751 = vrot.lane.b32.xlu0 %v2009_v14, %s1731_s21  ;;  %679 = vrot.lane.b32.xlu1 %v2009_v14, %s1732_s22  ;;  %v2682_v48 = vrot.slane %v2009_v14, 7 }
 0x19e   : > { %v2031_v19 = vpop.f32.mrf.mxu0 }
 0x19f   : > { %v602_v51 = vrot.slane %v2031_v19, 7 }
 0x1a0   : > { %v2049_v25 = vpop.f32.mrf.mxu1 }
 0x1a1   : > { %840 = vrot.lane.b32.xlu0 %v2009_v14, %s1733_s23  ;;  %1048 = vrot.lane.b32.xlu1 %v2009_v14, %s1734_s24 }
 0x1a2   : > { %v2071_v30 = vpop.f32.mrf.mxu1 }
 0x1a4   : > { %v2093_v35 = vpop.f32.mrf.mxu1 }
 0x1a5   : > { %960 = vrot.lane.b32.xlu0 %v2009_v14, %s1735_s25  ;;  %928 = vrot.lane.b32.xlu1 %v2009_v14, %s1736_s26 }
 0x1a6   : > { %v2101_v37 = vpop.f32.mrf.mxu1 }
 0x1a8   : > { %v2137_v45 = vpop.f32.mrf.mxu1 }
 0x1a9   : > { %1208 = vrot.lane.b32.xlu1 %v2009_v14, %s1737_s29  ;;  %677 = vrot.lane.b32.xlu0 %v2031_v19, %s1732_s22 }
 0x1aa   : > { %v2159_v50 = vpop.f32.mrf.mxu1 }
 0x1ad   : > { %1136 = vrot.lane.b32.xlu1 %v2009_v14, %s1738_s30  ;;  %926 = vrot.lane.b32.xlu0 %v2031_v19, %s1736_s26 }
 0x1b1   : > { %749 = vrot.lane.b32.xlu1 %v2031_v19, %s1731_s21  ;;  %755 = vrot.lane.b32.xlu0 %v2049_v25, %s1731_s21 }
 0x1b5   : > { %838 = vrot.lane.b32.xlu1 %v2031_v19, %s1733_s23  ;;  %964 = vrot.lane.b32.xlu0 %v2049_v25, %s1735_s25 }
 0x1b9   : > { %958 = vrot.lane.b32.xlu1 %v2031_v19, %s1735_s25  ;;  %932 = vrot.lane.b32.xlu0 %v2049_v25, %s1736_s26 }
 0x1bd   : > { %1046 = vrot.lane.b32.xlu1 %v2031_v19, %s1734_s24  ;;  %681 = vrot.lane.b32.xlu0 %v2071_v30, %s1732_s22 }
 0x1c1   : > { %683 = vrot.lane.b32.xlu1 %v2049_v25, %s1732_s22  ;;  %962 = vrot.lane.b32.xlu0 %v2071_v30, %s1735_s25 }
 0x1c5   : > { %844 = vrot.lane.b32.xlu1 %v2049_v25, %s1733_s23  ;;  %1050 = vrot.lane.b32.xlu0 %v2071_v30, %s1734_s24 }
 0x1c9   : > { %1052 = vrot.lane.b32.xlu1 %v2049_v25, %s1734_s24  ;;  %1144 = vrot.lane.b32.xlu0 %v2093_v35, %s1738_s30 }
 0x1cd   : > { %1212 = vrot.lane.b32.xlu1 %v2049_v25, %s1737_s29  ;;  %685 = vrot.lane.b32.xlu0 %v2101_v37, %s1732_s22 }
 0x1d1   : > { %1140 = vrot.lane.b32.xlu1 %v2049_v25, %s1738_s30  ;;  %757 = vrot.lane.b32.xlu0 %v2101_v37, %s1731_s21 }
 0x1d5   : > { %753 = vrot.lane.b32.xlu1 %v2071_v30, %s1731_s21  ;;  %966 = vrot.lane.b32.xlu0 %v2101_v37, %s1735_s25 }
 0x1d9   : > { %842 = vrot.lane.b32.xlu1 %v2071_v30, %s1733_s23  ;;  %1054 = vrot.lane.b32.xlu0 %v2101_v37, %s1734_s24 }
 0x1dd   : > { %1210 = vrot.lane.b32.xlu1 %v2071_v30, %s1737_s29  ;;  %1142 = vrot.lane.b32.xlu0 %v2101_v37, %s1738_s30 }
 0x1e1   : > { %930 = vrot.lane.b32.xlu1 %v2071_v30, %s1736_s26  ;;  %852 = vrot.lane.b32.xlu0 %v2137_v45, %s1733_s23 }
 0x1e5   : > { %1138 = vrot.lane.b32.xlu1 %v2071_v30, %s1738_s30  ;;  %972 = vrot.lane.b32.xlu0 %v2137_v45, %s1735_s25 }
 0x1e9   : > { %687 = vrot.lane.b32.xlu1 %v2093_v35, %s1732_s22  ;;  %1220 = vrot.lane.b32.xlu0 %v2137_v45, %s1737_s29 }
 0x1ed   : > { %759 = vrot.lane.b32.xlu1 %v2093_v35, %s1731_s21  ;;  %689 = vrot.lane.b32.xlu0 %v2159_v50, %s1732_s22 }
 0x1f1   : > { %848 = vrot.lane.b32.xlu1 %v2093_v35, %s1733_s23  ;;  %970 = vrot.lane.b32.xlu0 %v2159_v50, %s1735_s25 }
 0x1f5   : > { %968 = vrot.lane.b32.xlu1 %v2093_v35, %s1735_s25  ;;  %1275 = vperm.xlu0 %1704, %v1871_v20   ;;  %v610_v20 = vlaneseq }
 0x1f7   : > { %v2202_v52 = vshrl.u32 %v610_v20, 7 }
 0x1f9   : > { %1056 = vrot.lane.b32.xlu1 %v2093_v35, %s1734_s24  ;;  %1146 = vrot.lane.b32.xlu0 %v2159_v50, %s1738_s30  ;;  %vm612_vm2 = vcmp.lt.s32.totalorder %v2202_v52, 1  ;;  %vm781_vm3 = vcmp.lt.s32.totalorder %v2202_v52, 7 }
 0x1fa   : > { %v619_v20 = vsel %vm612_vm2, %v602_v51, %v2682_v48 }
 0x1fb   : > { %v663_v40 = vmul.f32 %v1961_v54, %v619_v20  ;;  %v2683_v20 = vrot.slane %v2137_v45, 7 }
 0x1fd   : > { %1216 = vrot.lane.b32.xlu1 %v2093_v35, %s1737_s29  ;;  %1134 = vrot.lane.b32.xlu0 %v2031_v19, %s1738_s30  ;;  %v620_v8 = vsel %vm612_vm2, %v2683_v20, %v602_v51 }
 0x1fe   : > { %v662_v49 = vmul.f32 %v1973_v60, %v620_v8 }
 0x201   : > { %936 = vrot.lane.b32.xlu1 %v2093_v35, %s1736_s26 }
 0x205   : > { %846 = vrot.lane.b32.xlu1 %v2101_v37, %s1733_s23 }
 0x209   : > { %1214 = vrot.lane.b32.xlu1 %v2101_v37, %s1737_s29 }
 0x20d   : > { %934 = vrot.lane.b32.xlu1 %v2101_v37, %s1736_s26 }
 0x20f   : > { %v2219_v18 = vpop.permute.xlu0 %751  ;;  %v680_v38 = vpop.permute.xlu1 %679 }
 0x210   : > { %v735_v1 = vmul.f32 %v1975_v61, %v680_v38  ;;  %v2685_v53 = vrot.slane %v2219_v18, 1  ;;  %v2730_v6 = vrot.slane %v2219_v18, 1 }
 0x211   : > { %691 = vrot.lane.b32.xlu1 %v2137_v45, %s1732_s22 }
 0x212   : > { %v2225_v34 = vadd.f32 %v735_v1, %v663_v40  ;;  %v1317_v1 = vld [vmem:[%s2678_s5] sm:$0xff] }
 0x213   : > { %v2227_v27 = vpop.permute.xlu0 %840  ;;  %v2229_v41 = vpop.permute.xlu1 %1048  ;;  %1637 = vmatprep.subr.mxu1 %v1317_v1 }
 0x214   : > { %1638 = vmatpush3.msra.mxu1 %v1317_v1 }
 0x215   : > { %763 = vrot.lane.b32.xlu1 %v2137_v45, %s1731_s21 }
 0x217   : > { %v961_v48 = vpop.permute.xlu0 %960  ;;  %v929_v36 = vpop.permute.xlu1 %928 }
 0x219   : > { %1060 = vrot.lane.b32.xlu1 %v2137_v45, %s1734_s24 }
 0x21b   : > { %v2235_v54 = vpop.permute.xlu1 %1208  ;;  %v678_v61 = vpop.permute.xlu0 %677 }
 0x21c   : > { %v734_v16 = vmul.f32 %v1971_v59, %v678_v61  ;;  %v2688_v59 = vrot.slane %v2227_v27, 7 }
 0x21d   : > { %940 = vrot.lane.b32.xlu1 %v2137_v45, %s1736_s26 }
 0x21e   : > { %v742_v20 = vadd.f32 %v734_v16, %v662_v49 }
 0x21f   : > { %v2242_v38 = vpop.permute.xlu1 %1136  ;;  %v2244_v40 = vpop.permute.xlu0 %926 }
 0x220   : > { %2723 = vst [vmem:[#allocation32_spill] sm:$0xff] %v2244_v40 }
 0x221   : > { %761 = vrot.lane.b32.xlu1 %v2159_v50, %s1731_s21 }
 0x223   : > { %v2250_v43 = vpop.permute.xlu1 %749  ;;  %v2252_v26 = vpop.permute.xlu0 %755 }
 0x224   : > { %v2684_v1 = vrot.slane %v2250_v43, 1 }
 0x225   : > { %850 = vrot.lane.b32.xlu1 %v2159_v50, %s1733_s23 }
 0x226   : > { %v788_v47 = vsel %vm781_vm3, %v2684_v1, %v2685_v53  ;;  %v983_v53 = vrot.slane %v961_v48, 1 }
 0x227   : > { %v823_v17 = vmul.f32 %v2001_v10, %v788_v47  ;;  %v2271_v40 = vpop.permute.xlu1 %838  ;;  %v2273_v51 = vpop.permute.xlu0 %964 }
 0x228   : > { %v2686_v61 = vrot.slane %v2271_v40, 7  ;;  %v985_v18 = vrot.slane %v2273_v51, 1 }
 0x229   : > { %1206 = vrot.lane.b32.xlu1 %v2031_v19, %s1737_s29  ;;  %v831_v8 = vadd.f32 %v823_v17, %v742_v20  ;;  %v604_v17 = vrot.slane %v2071_v30, 7 }
 0x22a   : > { %v876_v60 = vsel %vm612_vm2, %v2686_v61, %v2688_v59  ;;  %v1071_v61 = vrot.slane %v2229_v41, 7 }
 0x22b   : > { %v911_v10 = vmul.f32 %v2039_v22, %v876_v60  ;;  %v2286_v47 = vpop.permute.xlu1 %958  ;;  %v2288_v1 = vpop.permute.xlu0 %932  ;;  %v2689_v22 = vrot.slane %v2049_v25, 7 }
 0x22c   : > { %2724 = vst [vmem:[#allocation33_spill] sm:$0xff] %v2286_v47  ;;  %v2687_v16 = vrot.slane %v2286_v47, 1 }
 0x22d   : > { %v919_v49 = vadd.f32 %v911_v10, %v831_v8  ;;  %1058 = vrot.lane.b32.xlu1 %v2159_v50, %s1734_s24  ;;  %v617_v10 = vsel %vm612_vm2, %v604_v17, %v2689_v22 }
 0x22e   : > { %v2297_v19 = vsel %vm781_vm3, %v2687_v16, %v983_v53  ;;  %v665_v41 = vmul.f32 %v1977_v62, %v617_v10 }
 0x22f   : > { %v2301_v20 = vpop.permute.xlu1 %1046  ;;  %v682_v60 = vpop.permute.xlu0 %681  ;;  %v951_v48 = vadd.f32 %v929_v36, %v919_v49 }
 0x230   : > { %2725 = vst [vmem:[#allocation34_spill] sm:$0xff] %v2301_v20  ;;  %v2692_v8 = vrot.slane %v2301_v20, 7 }
 0x231   : > { %1218 = vrot.lane.b32.xlu1 %v2159_v50, %s1737_s29 }
 0x232   : > { %v2315_v30 = vsel %vm612_vm2, %v2692_v8, %v1071_v61 }
 0x233   : > { %2726 = vst [vmem:[#allocation35_spill] sm:$0xff] %v2315_v30  ;;  %v684_v16 = vpop.permute.xlu1 %683  ;;  %v963_v36 = vpop.permute.xlu0 %962 }
 0x234   : > { %v737_v49 = vmul.f32 %v1979_v63, %v684_v16  ;;  %v984_v59 = vrot.slane %v963_v36, 1 }
 0x235   : > { %938 = vrot.lane.b32.xlu1 %v2159_v50, %s1736_s26 }
 0x236   : > { %v2321_v22 = vadd.f32 %v737_v49, %v665_v41  ;;  %v995_v47 = vsel %vm781_vm3, %v983_v53, %v984_v59 }
 0x237   : > { %v1031_v20 = vmul.f32 %v2015_v15, %v995_v47  ;;  %v2326_v57 = vpop.permute.xlu1 %844  ;;  %v1051_v8 = vpop.permute.xlu0 %1050 }
 0x238   : > { %v1072_v30 = vrot.slane %v1051_v8, 7  ;;  %v2729_v8 = vrot.slane %v2009_v14, 7 }
 0x239   : > { %1148 = vrot.lane.b32.xlu1 %v2137_v45, %s1738_s30  ;;  %v1039_v62 = vadd.f32 %v1031_v20, %v951_v48 }
 0x23a   : > { %v1083_v63 = vsel %vm612_vm2, %v1071_v61, %v1072_v30  ;;  %v618_v20 = vsel %vm612_vm2, %v2729_v8, %v604_v17  ;;  %v736_v61 = vmul.f32 %v1989_v4, %v682_v60 }
 0x23b   : > { %v1119_v16 = vmul.f32 %v2037_v21, %v1083_v63  ;;  %v1053_v10 = vpop.permute.xlu1 %1052  ;;  %v2333_v36 = vpop.permute.xlu0 %1144  ;;  %v776_v63 = vrot.slane %v2252_v26, 1  ;;  %v865_v26 = vrot.slane %v2326_v57, 7 }
 0x23c   : > { %2727 = vst [vmem:[#allocation36_spill] sm:$0xff] %v2333_v36 }
 0x23d   : > { %v1127_v41 = vadd.f32 %v1119_v16, %v1039_v62  ;;  %v664_v16 = vmul.f32 %v1963_v55, %v618_v20 }
 0x23f   : > { %v2335_v53 = vpop.permute.xlu1 %1212  ;;  %v2337_v15 = vpop.permute.xlu0 %685 }
 0x240   : > { %2728 = vst [vmem:[#allocation37_spill] sm:$0xff] %v2337_v15  ;;  %v744_v15 = vadd.f32 %v736_v61, %v664_v16  ;;  %v1073_v61 = vrot.slane %v1053_v10, 7  ;;  %v1233_v51 = vrot.slane %v2335_v53, 1 }
 0x243   : > { %v1141_v47 = vpop.permute.xlu1 %1140  ;;  %v2339_v49 = vpop.permute.xlu0 %757 }
 0x247   : > { %v754_v48 = vpop.permute.xlu1 %753  ;;  %v2346_v21 = vpop.permute.xlu0 %966 }
 0x248   : > { %v775_v62 = vrot.slane %v754_v48, 1  ;;  %v986_v55 = vrot.slane %v2346_v21, 1 }
 0x24a   : > { %v786_v36 = vsel %vm781_vm3, %v775_v62, %v776_v63  ;;  %v787_v14 = vsel %vm781_vm3, %v2730_v6, %v775_v62 }
 0x24b   : > { %v824_v17 = vmul.f32 %v1995_v7, %v787_v14  ;;  %v825_v4 = vmul.f32 %v1999_v9, %v786_v36  ;;  %v843_v60 = vpop.permute.xlu1 %842  ;;  %v2358_v8 = vpop.permute.xlu0 %1054  ;;  %v2731_v7 = vrot.slane %v2227_v27, 7  ;;  %v993_v27 = vsel %vm781_vm3, %v985_v18, %v986_v55 }
 0x24c   : > { %v864_v20 = vrot.slane %v843_v60, 7  ;;  %v1074_v36 = vrot.slane %v2358_v8, 7  ;;  %v994_v14 = vsel %vm781_vm3, %v984_v59, %v985_v18  ;;  %v1033_v59 = vmul.f32 %v2067_v28, %v993_v27 }
 0x24d   : > { %v833_v48 = vadd.f32 %v825_v4, %v744_v15  ;;  %v832_v29 = vadd.f32 %v824_v17, %v2225_v34  ;;  %v1231_v34 = vrot.slane %v2235_v54, 1  ;;  %v1082_v4 = vsel %vm612_vm2, %v1072_v30, %v1073_v61 }
 0x24e   : > { %v874_v6 = vsel %vm612_vm2, %v864_v20, %v865_v26  ;;  %v875_v9 = vsel %vm612_vm2, %v2731_v7, %v864_v20  ;;  %v1120_v7 = vmul.f32 %v2089_v33, %v1082_v4 }
 0x24f   : > { %v913_v57 = vmul.f32 %v2007_v13, %v874_v6  ;;  %v1211_v62 = vpop.permute.xlu1 %1210  ;;  %v912_v15 = vmul.f32 %v2003_v11, %v875_v9  ;;  %v1081_v11 = vsel %vm612_vm2, %v1073_v61, %v1074_v36 }
 0x250   : > { %v1232_v16 = vrot.slane %v1211_v62, 1  ;;  %v1121_v18 = vmul.f32 %v2113_v39, %v1081_v11 }
 0x251   : > { %v921_v17 = vadd.f32 %v913_v57, %v833_v48  ;;  %v920_v10 = vadd.f32 %v912_v15, %v832_v29  ;;  %v1032_v48 = vmul.f32 %v2083_v32, %v994_v14  ;;  %v1192_v15 = vmul.f32 %v2135_v44, %v1141_v47  ;;  %v1143_v47 = vpop.permute.xlu0 %1142 }
 0x252   : > { %v1242_v13 = vsel %vm781_vm3, %v1232_v16, %v1233_v51  ;;  %v2391_v53 = vsel %vm781_vm3, %v1231_v34, %v1232_v16 }
 0x253   : > { %v953_v29 = vadd.f32 %v2288_v1, %v921_v17  ;;  %v931_v60 = vpop.permute.xlu1 %930  ;;  %v1279_v1 = vmul.f32 %v2198_v24, %v1242_v13 }
 0x254   : > { %v952_v20 = vadd.f32 %v931_v60, %v920_v10 }
 0x255   : > { %v1041_v6 = vadd.f32 %v1033_v59, %v953_v29  ;;  %v2425_v13 = vpop.permute.xlu0 %852 }
 0x256   : > { %v1040_v9 = vadd.f32 %v1032_v48, %v952_v20 }
 0x257   : > { %v2400_v57 = vadd.f32 %v1121_v18, %v1041_v6  ;;  %v1139_v62 = vpop.permute.xlu1 %1138 }
 0x258   : > { %v1128_v30 = vadd.f32 %v1120_v7, %v1040_v9  ;;  %v1191_v28 = vmul.f32 %v2077_v31, %v1139_v62  ;;  %v777_v31 = vrot.slane %v2339_v49, 1  ;;  %v2732_v62 = vrot.slane %v2137_v45, 7 }
 0x259   : > { %v2433_v18 = vpop.permute.xlu0 %972 }
 0x25a   : > { %v1200_v61 = vadd.f32 %v1192_v15, %v1128_v30  ;;  %v1199_v27 = vadd.f32 %v1191_v28, %v1127_v41  ;;  %v785_v41 = vsel %vm781_vm3, %v776_v63, %v777_v31 }
 0x25b   : > { %v2405_v16 = vpop.permute.xlu1 %687  ;;  %v826_v10 = vmul.f32 %v2005_v12, %v785_v41  ;;  %v2734_v41 = vrot.slane %v2250_v43, 1 }
 0x25c   : > { %v2407_v32 = vadd.f32 %v1279_v1, %v1199_v27  ;;  %v607_v1 = vrot.slane %v2093_v35, 7  ;;  %v2733_v27 = vrot.slane %v2271_v40, 7  ;;  %v2735_v35 = vrot.slane %v2049_v25, 7 }
 0x25d   : > { %v834_v49 = vadd.f32 %v826_v10, %v2321_v22  ;;  %v2442_v9 = vpop.permute.xlu0 %1220  ;;  %v869_v22 = vrot.slane %v2425_v13, 7  ;;  %v1190_v25 = vmul.f32 %v2127_v42, %v2242_v38  ;;  %v2740_v42 = vld [vmem:[#allocation32_spill] sm:$0xff] }
 0x25f   : > { %v2409_v39 = vpop.permute.xlu1 %759  ;;  %v877_v45 = vsel %vm612_vm2, %v869_v22, %v2733_v27 }
 0x260   : > { %v778_v43 = vrot.slane %v2409_v39, 1 }
 0x263   : > { %v2411_v33 = vpop.permute.xlu1 %848 }
 0x267   : > { %v2413_v14 = vpop.permute.xlu1 %968 }
 0x26b   : > { %v2415_v17 = vpop.permute.xlu1 %1056 }
 0x26f   : > { %v2417_v44 = vpop.permute.xlu1 %1216 }
 0x273   : > { %v2420_v24 = vpop.permute.xlu1 %936 }
 0x277   : > { %v847_v11 = vpop.permute.xlu1 %846 }
 0x278   : > { %v866_v4 = vrot.slane %v847_v11, 7 }
 0x27a   : > { %v873_v59 = vsel %vm612_vm2, %v865_v26, %v866_v4 }
 0x27b   : > { %v1215_v29 = vpop.permute.xlu1 %1214  ;;  %v914_v60 = vmul.f32 %v2045_v23, %v873_v59  ;;  %v608_v23 = vrot.slane %v2159_v50, 7  ;;  %v690_v50 = vpop.permute.xlu0 %689  ;;  %v910_v59 = vmul.f32 %v1991_v5, %v877_v45  ;;  %v2743_v45 = vld [vmem:[#allocation36_spill] sm:$0xff] }
 0x27c   : > { %v1234_v20 = vrot.slane %v1215_v29, 1 }
 0x27d   : > { %v2431_v48 = vadd.f32 %v914_v60, %v834_v49  ;;  %v613_v15 = vsel %vm612_vm2, %v608_v23, %v2732_v62  ;;  %v614_v29 = vsel %vm612_vm2, %v607_v1, %v608_v23  ;;  %v2737_v62 = vld [vmem:[#allocation37_spill] sm:$0xff] }
 0x27e   : > { %v1241_v12 = vsel %vm781_vm3, %v1233_v51, %v1234_v20 }
 0x27f   : > { %v1280_v63 = vmul.f32 %v2143_v46, %v1241_v12  ;;  %v2438_v6 = vpop.permute.xlu1 %934  ;;  %v606_v46 = vrot.slane %v2101_v37, 7 }
 0x281   : > { %v2440_v7 = vadd.f32 %v1280_v63, %v1200_v61  ;;  %v661_v61 = vmul.f32 %v1969_v58, %v613_v15  ;;  %v615_v58 = vsel %vm612_vm2, %v606_v46, %v607_v1  ;;  %v616_v40 = vsel %vm612_vm2, %v2735_v35, %v606_v46  ;;  %v2738_v15 = vld [vmem:[#allocation4_spill] sm:$0xff]  ;;  %v2490_v46 = vpop.permute.xlu0 %970 }
 0x282   : > { %v666_v49 = vmul.f32 %v1965_v56, %v616_v40  ;;  %v784_v56 = vsel %vm781_vm3, %v777_v31, %v778_v43  ;;  %v1235_v1 = vrot.slane %v2417_v44, 1  ;;  %v989_v35 = vrot.slane %v2433_v18, 1 }
 0x283   : > { %v692_v26 = vpop.permute.xlu1 %691 }
 0x284   : > { %v733_v51 = vmul.f32 %v1985_v2, %v692_v26  ;;  %v2736_v26 = vld [vmem:[#allocation12_spill] sm:$0xff]  ;;  %v1240_v40 = vsel %vm781_vm3, %v1234_v20, %v1235_v1 }
 0x285   : > { %v1030_v5 = vmul.f32 %v2736_v26, %v2297_v19  ;;  %v2742_v19 = vld [vmem:[#allocation7_spill] sm:$0xff]  ;;  %v2747_v26 = vld [vmem:[#allocation5_spill] sm:$0xff] }
 0x286   : > { %v741_v10 = vadd.f32 %v733_v51, %v661_v61  ;;  %v738_v51 = vmul.f32 %v2738_v15, %v2737_v62  ;;  %v2741_v61 = vld [vmem:[#allocation35_spill] sm:$0xff]  ;;  %v740_v62 = vmul.f32 %v2747_v26, %v690_v50  ;;  %v2523_v15 = vpop.permute.xlu0 %1275 }
 0x287   : > { %v764_v30 = vpop.permute.xlu1 %763  ;;  %v1118_v27 = vmul.f32 %v2742_v19, %v2741_v61  ;;  %v2750_v61 = vld [vmem:[#allocation31_spill] sm:$0xff] }
 0x288   : > { %v780_v28 = vrot.slane %v764_v30, 1  ;;  %v2739_v30 = vld [vmem:[#allocation2_spill] sm:$0xff]  ;;  %v1281_v50 = vmul.f32 %v2750_v61, %v1240_v40  ;;  %v2758_v61 = vld [vmem:[#allocation15_spill] sm:$0xff] }
 0x289   : > { %v668_v23 = vmul.f32 %v2739_v30, %v614_v29  ;;  %v2748_v30 = vld [vmem:[#allocation27_spill] sm:$0xff] }
 0x28a   : > { %v789_v2 = vsel %vm781_vm3, %v780_v28, %v2734_v41  ;;  %v2744_v41 = vld [vmem:[#allocation21_spill] sm:$0xff]  ;;  %v1147_v26 = vpop.permute.xlu0 %1146 }
 0x28b   : > { %v822_v37 = vmul.f32 %v1987_v3, %v789_v2  ;;  %v2465_v11 = vpop.permute.xlu1 %1060  ;;  %v2478_v3 = vmul.f32 %v1981_v0, %v615_v58  ;;  %v867_v0 = vrot.slane %v2411_v33, 7  ;;  %v2503_v2 = vmul.f32 %v2744_v41, %v2743_v45  ;;  %v2751_v45 = vld [vmem:[#allocation33_spill] sm:$0xff]  ;;  %v2762_v33 = vld [vmem:[#allocation18_spill] sm:$0xff] }
 0x28c   : > { %v987_v58 = vrot.slane %v2413_v14, 1  ;;  %v2746_v14 = vld [vmem:[#allocation6_spill] sm:$0xff] }
 0x28d   : > { %v830_v60 = vadd.f32 %v822_v37, %v741_v10  ;;  %v2745_v10 = vld [vmem:[#allocation19_spill] sm:$0xff]  ;;  %v872_v31 = vsel %vm612_vm2, %v866_v4, %v867_v0 }
 0x28e   : > { %v1193_v37 = vmul.f32 %v2745_v10, %v1143_v47  ;;  %v2519_v47 = vld [vmem:[%s2677_s4] ss:$0 sm:$0xff] }
 0x28f   : > { %v918_v12 = vadd.f32 %v910_v59, %v830_v60  ;;  %v2481_v63 = vpop.permute.xlu1 %940  ;;  %v746_v60 = vadd.f32 %v738_v51, %v666_v49  ;;  %v992_v51 = vsel %vm781_vm3, %v986_v55, %v987_v58 }
 0x290   : > { %v1201_v20 = vadd.f32 %v1193_v37, %v2400_v57  ;;  %v2752_v57 = vrot.slane %v2751_v45, 1  ;;  %v748_v37 = vadd.f32 %v740_v62, %v668_v23  ;;  %v2756_v62 = vld [vmem:[#allocation13_spill] sm:$0xff] }
 0x291   : > { %v950_v38 = vadd.f32 %v2740_v42, %v918_v12  ;;  %v827_v12 = vmul.f32 %v2746_v14, %v784_v56  ;;  %v1278_v42 = vmul.f32 %v2748_v30, %v2391_v53  ;;  %v1302_v53 = vadd.f32 %v2519_v47, %v2407_v32 }
 0x292   : > { %v997_v21 = vsel %vm781_vm3, %v989_v35, %v2752_v57 }
 0x293   : > { %v1038_v59 = vadd.f32 %v1030_v5, %v950_v38  ;;  %v762_v29 = vpop.permute.xlu1 %761  ;;  %v1075_v5 = vrot.slane %v2415_v17, 7  ;;  %v2749_v38 = vld [vmem:[#allocation10_spill] sm:$0xff]  ;;  %v835_v10 = vadd.f32 %v827_v12, %v746_v60  ;;  %v1310_v12 = vmax.f32 %v1302_v53, 0.0 }
 0x294   : > { %v779_v4 = vrot.slane %v762_v29, 1  ;;  %v915_v56 = vmul.f32 %v2749_v38, %v872_v31  ;;  %v2753_v17 = vld [vmem:[#allocation14_spill] sm:$0xff]  ;;  %v988_v31 = vrot.slane %v2490_v46, 1  ;;  %v1289_v38 = vadd.f32 %v1281_v50, %v1201_v20  ;;  %v2755_v46 = vld [vmem:[#allocation11_spill] sm:$0xff] }
 0x295   : > { %v1126_v49 = vadd.f32 %v1118_v27, %v1038_v59  ;;  %v1080_v32 = vsel %vm612_vm2, %v1074_v36, %v1075_v5  ;;  %v2754_v59 = vld [vmem:[#allocation17_spill] sm:$0xff] }
 0x296   : > { %v782_v19 = vsel %vm781_vm3, %v779_v4, %v780_v28  ;;  %v954_v28 = vadd.f32 %v2438_v6, %v2431_v48  ;;  %v1034_v29 = vmul.f32 %v2754_v59, %v992_v51  ;;  %v923_v30 = vadd.f32 %v915_v56, %v835_v10 }
 0x297   : > { %v829_v27 = vmul.f32 %v2753_v17, %v782_v19  ;;  %v851_v55 = vpop.permute.xlu1 %850  ;;  %v1198_v41 = vadd.f32 %v1190_v25, %v1126_v49  ;;  %v1077_v25 = vrot.slane %v2465_v11, 7  ;;  %v1303_v6 = vadd.f32 %v2519_v47, %v2440_v7  ;;  %v2757_v11 = vld [vmem:[#allocation3_spill] sm:$0xff]  ;;  %v2759_v7 = vld [vmem:[#allocation34_spill] sm:$0xff] }
 0x298   : > { %v868_v40 = vrot.slane %v851_v55, 7  ;;  %v739_v20 = vmul.f32 %v2757_v11, %v2405_v16  ;;  %v991_v13 = vsel %vm781_vm3, %v987_v58, %v988_v31  ;;  %v783_v49 = vsel %vm781_vm3, %v778_v43, %v779_v4  ;;  %v2761_v55 = vld [vmem:[#allocation8_spill] sm:$0xff] }
 0x299   : > { %v1286_v14 = vadd.f32 %v1278_v42, %v1198_v41  ;;  %v837_v8 = vadd.f32 %v829_v27, %v748_v37  ;;  %v1037_v42 = vmul.f32 %v2756_v62, %v997_v21  ;;  %v1122_v50 = vmul.f32 %v2758_v61, %v1080_v32  ;;  %v1135_v27 = vpop.permute.xlu0 %1134 }
 0x29a   : > { %v870_v23 = vsel %vm612_vm2, %v868_v40, %v869_v22  ;;  %v1042_v22 = vadd.f32 %v1034_v29, %v954_v28  ;;  %v2760_v19 = vrot.slane %v2759_v7, 7  ;;  %v1304_v45 = vadd.f32 %v2519_v47, %v1289_v38  ;;  %v2764_v28 = vld [vmem:[#allocation9_spill] sm:$0xff] }
 0x29b   : > { %v917_v60 = vmul.f32 %v2755_v46, %v870_v23  ;;  %v2560_v36 = vpop.permute.xlu1 %1206  ;;  %v1301_v48 = vadd.f32 %v2519_v47, %v1286_v14  ;;  %v955_v58 = vadd.f32 %v2420_v24, %v923_v30  ;;  %v871_v39 = vsel %vm612_vm2, %v867_v0, %v868_v40  ;;  %v2763_v0 = vld [vmem:[#allocation16_spill] sm:$0xff]  ;;  %v2765_v29 = vld [vmem:[#allocation29_spill] sm:$0xff] }
 0x29c   : > { %v1085_v53 = vsel %vm612_vm2, %v1077_v25, %v2760_v19  ;;  %v1230_v16 = vrot.slane %v2560_v36, 1  ;;  %v1311_v57 = vmax.f32 %v1303_v6, 0.0  ;;  %v747_v21 = vadd.f32 %v739_v20, %v2478_v3  ;;  %v2766_v23 = vld [vmem:[#allocation20_spill] sm:$0xff]  ;;  %v2768_v20 = vld [vmem:[#allocation26_spill] sm:$0xff] }
 0x29d   : > { %v925_v51 = vadd.f32 %v917_v60, %v837_v8  ;;  %v1309_v56 = vmax.f32 %v1301_v48, 0.0  ;;  %v1237_v17 = vrot.slane %v2442_v9, 1  ;;  %v828_v41 = vmul.f32 %v2761_v55, %v783_v49  ;;  %v2767_v60 = vld [vmem:[#allocation23_spill] sm:$0xff] }
 0x29e   : > { %v1035_v24 = vmul.f32 %v2762_v33, %v991_v13  ;;  %v1130_v37 = vadd.f32 %v1122_v50, %v1042_v22  ;;  %v1125_v40 = vmul.f32 %v2763_v0, %v1085_v53  ;;  %v1244_v3 = vsel %vm781_vm3, %v1230_v16, %v1231_v34  ;;  %v2769_v13 = vld [vmem:[#allocation28_spill] sm:$0xff]  ;;  %v1560_v33 = vld [vmem:[%s2679_s6] ss:$0 sm:$0xff] }
 0x29f   : > { %v957_v43 = vadd.f32 %v2481_v63, %v925_v51  ;;  %v1059_v4 = vpop.permute.xlu1 %1058  ;;  %1639 = vmatprep.mubr.msk.f32.mxu1 %vm464_vm1, %v1309_v56  ;;  %v1312_v32 = vmax.f32 %v1304_v45, 0.0  ;;  %v916_v59 = vmul.f32 %v2764_v28, %v871_v39  ;;  %v1197_v14 = vmul.f32 %v2765_v29, %v1135_v27  ;;  %v2770_v51 = vld [vmem:[#allocation22_spill] sm:$0xff]  ;;  %v2771_v50 = vld [vmem:[#allocation24_spill] sm:$0xff]  ;;  %v2772_v39 = vld [vmem:[#allocation25_spill] sm:$0xff] }
 0x2a0   : > { %v1076_v10 = vrot.slane %v1059_v4, 7  ;;  %1640 = vmatmul.mubr.msk.f32.vlgmr.msra.gmra.mxu1 %vm464_vm1, %v1310_v12  ;;  %v1043_v38 = vadd.f32 %v1035_v24, %v955_v58  ;;  %v990_v54 = vsel %vm781_vm3, %v988_v31, %v989_v35  ;;  %v1195_v34 = vmul.f32 %v2767_v60, %v1147_v26 }
 0x2a1   : > { %v1045_v63 = vadd.f32 %v1037_v42, %v957_v43  ;;  %1642 = vmatprep.mubr.msk.f32.mxu1 %vm464_vm1, %v1311_v57  ;;  %v1202_v48 = vadd.f32 %v2503_v2, %v1130_v37  ;;  %v1285_v12 = vmul.f32 %v2523_v15, %v1244_v3  ;;  %v1036_v56 = vmul.f32 %v2770_v51, %v990_v54 }
 0x2a2   : > { %v1079_v9 = vsel %vm612_vm2, %v1075_v5, %v1076_v10  ;;  %v836_v5 = vadd.f32 %v828_v41, %v747_v21  ;;  %v1078_v42 = vsel %vm612_vm2, %v1076_v10, %v1077_v25  ;;  %v1245_v44 = vsel %vm781_vm3, %v1237_v17, %v1230_v16  ;;  %v2773_v21 = vld [vmem:[#allocation30_spill] sm:$0xff] }
 0x2a3   : > { %v1133_v30 = vadd.f32 %v1125_v40, %v1045_v63  ;;  %v1123_v8 = vmul.f32 %v2766_v23, %v1079_v9  ;;  %v1219_v46 = vpop.permute.xlu1 %1218  ;;  %v1124_v7 = vmul.f32 %v2771_v50, %v1078_v42  ;;  %v1284_v27 = vmul.f32 %v2773_v21, %v1245_v44  ;;  %v1707_v40 = vld [vmem:[%s1815_s20 + $0x8] sm:$0xff]  ;;  %v1712_v42 = vld [vmem:[%s1815_s20 + $0x20] sm:$0xff] }
 0x2a4   : > { %v1236_v36 = vrot.slane %v1219_v46, 1  ;;  %1643 = vmatmul.mubr.msk.f32.gmra.mxu1 %vm464_vm1, %v1312_v32  ;;  %v924_v31 = vadd.f32 %v916_v59, %v836_v5  ;;  %v1708_v32 = vld [vmem:[%s1815_s20] sm:$0xff]  ;;  %v1710_v46 = vld [vmem:[%s1815_s20 + $0x10] sm:$0xff] }
 0x2a5   : > { %v1205_v6 = vadd.f32 %v1197_v14, %v1133_v30  ;;  %v1131_v62 = vadd.f32 %v1123_v8, %v1043_v38  ;;  %v1709_v30 = vld [vmem:[%s1815_s20 + $0x18] sm:$0xff] }
 0x2a6   : > { %v1238_v18 = vsel %vm781_vm3, %v1236_v36, %v1237_v17  ;;  %v1239_v35 = vsel %vm781_vm3, %v1235_v1, %v1236_v36 }
 0x2a7   : > { %v1293_v26 = vadd.f32 %v1285_v12, %v1205_v6  ;;  %v1203_v11 = vadd.f32 %v1195_v34, %v1131_v62  ;;  %v1282_v2 = vmul.f32 %v2768_v20, %v1239_v35  ;;  %v1283_v22 = vmul.f32 %v2769_v13, %v1238_v18  ;;  %v939_v15 = vpop.permute.xlu1 %938  ;;  %v1713_v20 = vld [vmem:[%s1815_s20 + $0x38] sm:$0xff] }
 0x2a8   : > { %v956_v49 = vadd.f32 %v939_v15, %v924_v31  ;;  %v1714_v15 = vld [vmem:[%s1815_s20 + $0x30] sm:$0xff] }
 0x2a9   : > { %v1290_v25 = vadd.f32 %v1282_v2, %v1202_v48  ;;  %v1291_v61 = vadd.f32 %v1283_v22, %v1203_v11  ;;  %v1308_v52 = vadd.f32 %v2519_v47, %v1293_v26  ;;  %v1711_v48 = vld [vmem:[%s1815_s20 + $0x28] sm:$0xff] }
 0x2aa   : > { %v1044_v19 = vadd.f32 %v1036_v56, %v956_v49 }
 0x2ab   : > { %v1149_v1 = vpop.permute.xlu1 %1148  ;;  %v1305_v53 = vadd.f32 %v2519_v47, %v1290_v25  ;;  %v1306_v45 = vadd.f32 %v2519_v47, %v1291_v61  ;;  %v1316_v10 = vmax.f32 %v1308_v52, 0.0 }
 0x2ac   : > { %v1132_v58 = vadd.f32 %v1124_v7, %v1044_v19  ;;  %v1196_v43 = vmul.f32 %v2772_v39, %v1149_v1 }
 0x2ad   : > { %v1313_v4 = vmax.f32 %v1305_v53, 0.0  ;;  %v1314_v57 = vmax.f32 %v1306_v45, 0.0 }
 0x2ae   : > { %v1204_v55 = vadd.f32 %v1196_v43, %v1132_v58 }
 0x2af   : > { %1645 = vmatprep.mubr.msk.f32.mxu1 %vm464_vm1, %v1313_v4 }
 0x2b0   : > { %v1292_v41 = vadd.f32 %v1284_v27, %v1204_v55  ;;  %1646 = vmatmul.mubr.msk.f32.gmra.mxu1 %vm464_vm1, %v1314_v57 }
 0x2b2   : > { %v1307_v16 = vadd.f32 %v2519_v47, %v1292_v41 }
 0x2b4   : > { %v1315_v17 = vmax.f32 %v1307_v16, 0.0 }
 0x2b6   : > { %1648 = vmatprep.mubr.msk.f32.mxu1 %vm464_vm1, %v1315_v17 }
 0x2b7   : > { %1649 = vmatmul.mubr.msk.f32.gmra.mxu1 %vm464_vm1, %v1316_v10 }
 0x360   : > { %v1641_v24 = vpop.f32.mrf.mxu1 }
 0x361   : > { %v1421_v37 = vadd.f32 %v1641_v24, %v1560_v33 }
 0x362   : > { %v1415_v0 = vpop.f32.mrf.mxu1 }
 0x363   : > { %v1455_v63 = vadd.f32 %v1707_v40, %v1421_v37  ;;  %v1416_v3 = vadd.f32 %v1560_v33, %v1415_v0 }
 0x364   : > { %v1644_v47 = vpop.f32.mrf.mxu1 }
 0x365   : > { %v1463_v9 = vmax.f32 %v1455_v63, 0.0  ;;  %v1454_v28 = vadd.f32 %v1708_v32, %v1416_v3  ;;  %v1431_v59 = vadd.f32 %v1644_v47, %v1560_v33 }
 0x366   : > { %v1425_v29 = vpop.f32.mrf.mxu1 }
 0x367   : > { %1471 = vst.msk [vmem:[%s2645_s18 + $0x8] sm:$0xff] %vm325_vm0, %v1463_v9  ;;  %v1462_v14 = vmax.f32 %v1454_v28, 0.0  ;;  %v1457_v38 = vadd.f32 %v1709_v30, %v1431_v59  ;;  %v1426_v23 = vadd.f32 %v1560_v33, %v1425_v29 }
 0x369   : > { %1470 = vst.msk [vmem:[%s2645_s18] sm:$0xff] %vm325_vm0, %v1462_v14  ;;  %v1465_v8 = vmax.f32 %v1457_v38, 0.0  ;;  %v1456_v54 = vadd.f32 %v1710_v46, %v1426_v23 }
 0x36b   : > { %1473 = vst.msk [vmem:[%s2645_s18 + $0x18] sm:$0xff] %vm325_vm0, %v1465_v8  ;;  %v1464_v60 = vmax.f32 %v1456_v54, 0.0 }
 0x36d   : > { %1472 = vst.msk [vmem:[%s2645_s18 + $0x10] sm:$0xff] %vm325_vm0, %v1464_v60 }
 0x370   : > { %v1647_v34 = vpop.f32.mrf.mxu1 }
 0x371   : > { %v1441_v36 = vadd.f32 %v1647_v34, %v1560_v33 }
 0x372   : > { %v1435_v5 = vpop.f32.mrf.mxu1 }
 0x373   : > { %v1459_v6 = vadd.f32 %v1711_v48, %v1441_v36  ;;  %v1436_v12 = vadd.f32 %v1560_v33, %v1435_v5 }
 0x375   : > { %v1467_v62 = vmax.f32 %v1459_v6, 0.0  ;;  %v1458_v18 = vadd.f32 %v1712_v42, %v1436_v12 }
 0x377   : > { %1475 = vst.msk [vmem:[%s2645_s18 + $0x28] sm:$0xff] %vm325_vm0, %v1467_v62  ;;  %v1466_v35 = vmax.f32 %v1458_v18, 0.0  ;;  %v1650_v31 = vpop.f32.mrf.mxu1 }
 0x378   : > { %v1451_v26 = vadd.f32 %v1650_v31, %v1560_v33 }
 0x379   : > { %1474 = vst.msk [vmem:[%s2645_s18 + $0x20] sm:$0xff] %vm325_vm0, %v1466_v35  ;;  %v1445_v11 = vpop.f32.mrf.mxu1 }
 0x37a   : > { %v1461_v2 = vadd.f32 %v1713_v20, %v1451_v26  ;;  %v1446_v13 = vadd.f32 %v1560_v33, %v1445_v11 }
 0x37c   : > { %v1469_v22 = vmax.f32 %v1461_v2, 0.0  ;;  %v1460_v49 = vadd.f32 %v1714_v15, %v1446_v13 }
 0x37e   : > { %1477 = vst.msk [vmem:[%s2645_s18 + $0x38] sm:$0xff] %vm325_vm0, %v1469_v22  ;;  %v1468_v51 = vmax.f32 %v1460_v49, 0.0 }
 0x380   : > { %1476 = vst.msk [vmem:[%s2645_s18 + $0x30] sm:$0xff] %vm325_vm0, %v1468_v51 }
 0x381 PF: > { %s18_s27 = sadd.s32 1, %s1721_s27  }
 0x382   : > { %p15_p4 = scmp.ge.s32.totalorder %s18_s27, 4  }
 0x384   :  { %17 = sbr.rel (!%p15_p4) target bundleno = 1 (0x1), region = 82 }

</bundles_post_ra>
